<compile_context>
chip_gen: v5e
topology: v5e:2x2
jax: 0.10.0
libtpu: 0.0.40
codegen_flags: <defaults>
</compile_context>

<pallas_src>
import jax
import jax.numpy as jnp
from jax.experimental import pallas as pl
from jax.experimental.pallas import tpu as pltpu

_LANE = 128
# Per-block byte target.  x-in + x-out, each double-buffered: ~4x this in VMEM,
# comfortably under the default scoped VMEM limit on v5e/v6e/v7x while big enough
# to hide per-step overhead and run unmasked lane-dense stores.
_TARGET_BLOCK_BYTES = 2 * 1024 * 1024


def _attention_kernel(x_ref, w_ref, b_ref, o_ref):
    # x_ref: (bt, C, st) tile of the (B, C, H*W) input
    # w_ref: (1, C) conv1x1 weights (VMEM), b_ref: (1,) bias scalar (SMEM)
    xf = x_ref[...].astype(jnp.float32)                 # cast in-kernel, not in wrapper
    w = w_ref[...].astype(jnp.float32)                  # (1, C)
    bias = b_ref[0]                                     # scalar from SMEM

    # 1x1 conv to one output channel: per-pixel dot over the channel (sublane) axis.
    logits = jnp.sum(xf * w[:, :, None], axis=1, keepdims=True) + bias   # (bt, 1, st)
    att = jax.nn.sigmoid(logits)                                         # attention map

    o_ref[...] = (xf * att).astype(o_ref.dtype)         # gate, broadcast over channels


def attention_module(x, weight, bias):
    """x: (B, C, H, W); weight: (C,) conv1x1 weights; bias: (1,). Returns (B, C, H, W)."""
    B, C, H, W = x.shape
    HW = H * W
    x2 = x.reshape(B, C, HW)                            # free reshape (contiguous)
    w2 = jnp.asarray(weight, jnp.float32).reshape(1, C)
    b1 = jnp.asarray(bias, jnp.float32).reshape(1)

    itemsize = jnp.dtype(x.dtype).itemsize
    plane_bytes = C * HW * itemsize                     # bytes of one (C, HW) plane

    if plane_bytes <= _TARGET_BLOCK_BYTES:
        # Whole spatial plane fits: pack several batches per block to amortize
        # per-grid-step overhead (last two block dims equal the full array dims,
        # so the (8,128) constraint is trivially satisfied).
        bt = int(max(1, min(B, _TARGET_BLOCK_BYTES // max(plane_bytes, 1))))
        st = HW
    else:
        bt = 1
        if HW <= _LANE:
            # Very large C with tiny spatial extent: full-extent block is the only
            # legal shape; block may exceed the byte target but stays legal.
            st = HW
        else:
            # Largest lane-aligned (128-multiple) spatial tile under the budget.
            cap = max(_LANE, (_TARGET_BLOCK_BYTES // (itemsize * C)) // _LANE * _LANE)
            full_aligned = HW if HW % _LANE == 0 else (HW // _LANE) * _LANE
            st = int(min(full_aligned, cap))
            # Partial tail blocks are fine: lanes past the bound are masked on store
            # and every pixel is computed independently.

    grid = (pl.cdiv(B, bt), pl.cdiv(HW, st))
    x_spec = pl.BlockSpec((bt, C, st), lambda b, t: (b, 0, t))

    out = pl.pallas_call(
        _attention_kernel,
        out_shape=jax.ShapeDtypeStruct((B, C, HW), x.dtype),
        grid=grid,
        in_specs=[
            x_spec,                                                   # x tile (VMEM)
            pl.BlockSpec((1, C), lambda b, t: (0, 0)),                # conv weights
            pl.BlockSpec(memory_space=pltpu.MemorySpace.SMEM),        # conv bias scalar
        ],
        out_specs=x_spec,
        compiler_params=pltpu.CompilerParams(
            dimension_semantics=("parallel", "parallel"),
        ),
    )(x2, w2, b1)
    return out.reshape(B, C, H, W)


def _reference(x, weight, bias):
    xf = x.astype(jnp.float32)
    logits = jnp.einsum("bchw,c->bhw", xf, weight.astype(jnp.float32))
    logits = logits + bias.astype(jnp.float32)[0]
    att = jax.nn.sigmoid(logits)
    return (xf * att[:, None, :, :]).astype(x.dtype)


if __name__ == "__main__":
    key = jax.random.PRNGKey(0)
    kx, kw, kb = jax.random.split(key, 3)
    B, C, H, W = 2, 4, 16, 16
    x = jax.random.normal(kx, (B, C, H, W), dtype=jnp.float32)
    weight = jax.random.normal(kw, (C,), dtype=jnp.float32) * 0.5
    bias = jax.random.normal(kb, (1,), dtype=jnp.float32) * 0.1

    out = attention_module(x, weight, bias)
    jax.block_until_ready(out)

    ref = _reference(x, weight, bias)
    assert out.shape == x.shape, (out.shape, x.shape)
    assert jnp.allclose(out, ref, rtol=1e-5, atol=1e-5), (
        jnp.max(jnp.abs(out - ref)))
    print("KERNEL_OK")
</pallas_src>

<mosaic_0001>
module attributes {stable_mosaic.version = 11 : i64} {
  func.func @_attention_kernel(%arg0: i32, %arg1: i32, %arg2: memref<2x4x256xf32, #tpu.memory_space<vmem>>, %arg3: memref<1x4xf32, #tpu.memory_space<vmem>>, %arg4: memref<1xf32, #tpu.memory_space<smem>>, %arg5: memref<2x4x256xf32, #tpu.memory_space<vmem>>) attributes {dimension_semantics = [#tpu.dimension_semantics<parallel>, #tpu.dimension_semantics<parallel>], iteration_bounds = array<i64: 1, 1>, scalar_prefetch = 0 : i64, scratch_operands = 0 : i64, tpu.core_type = #tpu.core_type<tc>, window_params = [{transform_indices = @transform_0, window_bounds = array<i64: 2, 4, 256>}, {pipeline_mode = #tpu.pipeline_mode<synchronous>, transform_indices = @transform_1, window_bounds = array<i64: 1, 4>}, {transform_indices = @transform_2, window_bounds = array<i64: 1>}, {transform_indices = @transform_3, window_bounds = array<i64: 2, 4, 256>}]} {
    %c0 = arith.constant 0 : index
    %c0_0 = arith.constant 0 : index
    %c0_1 = arith.constant 0 : index
    %0 = vector.load %arg2[%c0, %c0_0, %c0_1] : memref<2x4x256xf32, #tpu.memory_space<vmem>>, vector<2x4x256xf32>
    %c0_2 = arith.constant 0 : index
    %c0_3 = arith.constant 0 : index
    %1 = vector.load %arg3[%c0_2, %c0_3] : memref<1x4xf32, #tpu.memory_space<vmem>>, vector<1x4xf32>
    %c0_4 = arith.constant 0 : index
    %2 = memref.load %arg4[%c0_4] : memref<1xf32, #tpu.memory_space<smem>>
    %3 = vector.shape_cast %1 : vector<1x4xf32> to vector<1x4x1xf32>
    %4 = vector.broadcast %3 : vector<1x4x1xf32> to vector<2x4x256xf32>
    %5 = arith.mulf %0, %4 : vector<2x4x256xf32>
    %cst = arith.constant dense<0.000000e+00> : vector<2x256xf32>
    %6 = vector.multi_reduction <add>, %5, %cst [1] : vector<2x4x256xf32> to vector<2x256xf32>
    %7 = vector.shape_cast %6 : vector<2x256xf32> to vector<2x1x256xf32>
    %8 = vector.broadcast %2 : f32 to vector<2x1x256xf32>
    %9 = arith.addf %7, %8 : vector<2x1x256xf32>
    %10 = arith.negf %9 : vector<2x1x256xf32>
    %11 = math.exp %10 : vector<2x1x256xf32>
    %cst_5 = arith.constant 1.000000e+00 : f32
    %12 = vector.broadcast %cst_5 : f32 to vector<2x1x256xf32>
    %13 = arith.addf %12, %11 : vector<2x1x256xf32>
    %14 = arith.divf %12, %13 : vector<2x1x256xf32>
    %15 = vector.broadcast %14 : vector<2x1x256xf32> to vector<2x4x256xf32>
    %16 = arith.mulf %0, %15 : vector<2x4x256xf32>
    %c0_6 = arith.constant 0 : index
    %c0_7 = arith.constant 0 : index
    %c0_8 = arith.constant 0 : index
    %17 = vector.load %arg5[%c0_6, %c0_7, %c0_8] : memref<2x4x256xf32, #tpu.memory_space<vmem>>, vector<2x4x256xf32>
    tpu.vector_store %arg5[%c0_6, %c0_7, %c0_8], %16 {strides = array<i32>} : memref<2x4x256xf32, #tpu.memory_space<vmem>>, vector<2x4x256xf32>,
    return
  }
  func.func @transform_0(%arg0: i32, %arg1: i32) -> (i32, i32, i32) {
    %c0_i32 = arith.constant 0 : i32
    %c0_i32_0 = arith.constant 0 : i32
    return %arg0, %c0_i32, %arg1 : i32, i32, i32
  }
  func.func @transform_1(%arg0: i32, %arg1: i32) -> (i32, i32) {
    %c0_i32 = arith.constant 0 : i32
    %c0_i32_0 = arith.constant 0 : i32
    %c0_i32_1 = arith.constant 0 : i32
    return %c0_i32, %c0_i32_0 : i32, i32
  }
  func.func @transform_2(%arg0: i32, %arg1: i32) -> i32 {
    %c0_i32 = arith.constant 0 : i32
    %c0_i32_0 = arith.constant 0 : i32
    return %c0_i32 : i32
  }
  func.func @transform_3(%arg0: i32, %arg1: i32) -> (i32, i32, i32) {
    %c0_i32 = arith.constant 0 : i32
    %c0_i32_0 = arith.constant 0 : i32
    return %arg0, %c0_i32, %arg1 : i32, i32, i32
  }
}

</mosaic_0001>

<bundles_post_ra>
// kernel: tpu_custom_call.1
= control target key start
LH: loop header
LB: loop body
LE: loop exit
PB: predicated region body
PF: predicated region fallthrough
CT: control target
= control target key end

     0   :  { %9 = vsyncpa [#allocation4], 0  ;;  %s366_s0 = inlined_call_operand.hbm [shape: f32[2,4,256], index: 0, kind: input, shape index: {}]   ;;  %s367_s1 = inlined_call_operand.vmem [shape: f32[1,4], index: 1, kind: input, shape index: {}]   ;;  %s368_s2 = inlined_call_operand.<no memory space> [shape: f32[1], index: 2, kind: input, shape index: {}]   ;;  %s369_s3 = inlined_call_operand.hbm [shape: f32[2,4,256], index: 3, kind: output, shape index: {}]  }
   0x1   :  { %10 = vsyncpa [#allocation5], 0  ;;  %s15_s14 = sshll.u32 %s366_s0, 4  ;;  %s286_s15 = smov [#allocation3]   ;;  %s16_s14 = int_to_ptr.hbm [resolvable:$true] %s15_s14 }
   0x2   :  { %s17_s16 = sshll.u32 %s286_s15, 4  ;;  %s287_s17 = smov 128   ;;  %s18_s16 = int_to_ptr.vmem [resolvable:$true] %s17_s16 }
   0x3   :  { %s288_s18 = smov 8  }
   0x4   :  { %23 = dma.hbm_to_vmem [thread:$0]  %s16_s14, 256, %s18_s16, [#allocation4], %s287_s17, %s287_s17, %s288_s18  }
   0x5   :  { %282 = dma.done.wait [#allocation4], 256  }
   0x6   :  { %283 = vsyncadd [#allocation4], 4294967040  ;;  %v37_v0 = vlaneseq  ;;  %v217_v2 = vld [vmem:[%s367_s1] ss:$0 sm:$0xff]  ;;  %v289_v3 = vmov 839922192   ;;  %v93_v40 = vstv %s368_s2 }
   0x7   :  { %v45_v4 = vunpack.c.l.s4 %v289_v3  ;;  %v320_v7 = vld [vmem:[#allocation3] sm:$0xff]  ;;  %v322_v8 = vld [vmem:[#allocation3 + $0x8] sm:$0xff]  ;;  %vm64_vm0 = vcmask 1043456   ;;  %s290_s2 = smov [#allocation6]   ;;  %s194_s24 = sshll.u32 %s369_s3, 4  ;;  %s195_s24 = int_to_ptr.hbm [resolvable:$true] %s194_s24 }
   0x8   :  { %v38_v1 = vshrl.u32 %v37_v0, 7  ;;  %s192_s21 = sshll.u32 %s290_s2, 4  ;;  %s193_s21 = int_to_ptr.vmem [resolvable:$true] %s192_s21 }
   0x9   :  { %v46_v5 = vunpack.c.0.s8 %v45_v4 }
   0xa   :  { %216 = vset.pattern.permute.xlu0 %v38_v1 }
  0x12   :  { %41 = vperm.xlu0 %216, %v217_v2  }
  0x84   :  { %v42_v6 = vpop.permute.xlu0 %41 }
  0x85   :  { %v47_v9 = vperm.slane %v42_v6, %v46_v5 }
  0x87   :  { %v49_v10 = vmul.f32 %v47_v9, %v320_v7  ;;  %v50_v11 = vmul.f32 %v47_v9, %v322_v8 }
  0x89   :  { %53 = vst [vmem:[#allocation1] ss:$2 sm:$0xff] %v49_v10 }
  0x8a   :  { %57 = vst [vmem:[#allocation1 + $0x10] ss:$2 sm:$0xff] %v50_v11 }
  0x90   :  { %v54_v12 = vld.sshfl [vmem:[#allocation1] sm:$0xff pattern:$0x75316420]  ;;  %v55_v13 = vld.sshfl [vmem:[#allocation1 + $0x8] sm:$0xff pattern:$0x75316420] }
  0x91   :  { %v58_v14 = vld.sshfl [vmem:[#allocation1 + $0x10] sm:$0xff pattern:$0x75316420]  ;;  %v59_v15 = vld.sshfl [vmem:[#allocation1 + $0x18] sm:$0xff pattern:$0x75316420] }
  0x92   :  { %v65_v16 = vsel %vm64_vm0, %v54_v12, 0.0  ;;  %v72_v17 = vsel %vm64_vm0, %v55_v13, 0.0  ;;  %v79_v18 = vsel %vm64_vm0, %v58_v14, 0.0  ;;  %v86_v19 = vsel %vm64_vm0, %v59_v15, 0.0 }
  0x93   :  { %v66_v20 = vrot.slane %v65_v16, 4  ;;  %v73_v21 = vrot.slane %v72_v17, 4  ;;  %v80_v22 = vrot.slane %v79_v18, 4  ;;  %v87_v23 = vrot.slane %v86_v19, 4 }
  0x95   :  { %v67_v24 = vadd.f32 %v66_v20, %v65_v16  ;;  %v74_v25 = vadd.f32 %v73_v21, %v72_v17  ;;  %v81_v26 = vadd.f32 %v80_v22, %v79_v18  ;;  %v88_v27 = vadd.f32 %v87_v23, %v86_v19 }
  0x97   :  { %v68_v28 = vrot.slane %v67_v24, 2  ;;  %v75_v29 = vrot.slane %v74_v25, 2  ;;  %v82_v30 = vrot.slane %v81_v26, 2  ;;  %v89_v31 = vrot.slane %v88_v27, 2 }
  0x99   :  { %v69_v32 = vadd.f32 %v68_v28, %v67_v24  ;;  %v76_v33 = vadd.f32 %v75_v29, %v74_v25  ;;  %v83_v34 = vadd.f32 %v82_v30, %v81_v26  ;;  %v90_v35 = vadd.f32 %v89_v31, %v88_v27 }
  0x9b   :  { %v70_v36 = vrot.slane %v69_v32, 1  ;;  %v77_v37 = vrot.slane %v76_v33, 1  ;;  %v84_v38 = vrot.slane %v83_v34, 1  ;;  %v91_v39 = vrot.slane %v90_v35, 1 }
  0x9d   :  { %v71_v41 = vadd.f32 %v70_v36, %v69_v32  ;;  %v78_v42 = vadd.f32 %v77_v37, %v76_v33  ;;  %v85_v43 = vadd.f32 %v84_v38, %v83_v34  ;;  %v92_v44 = vadd.f32 %v91_v39, %v90_v35 }
  0x9f   :  { %v94_v45 = vadd.f32 %v93_v40, %v71_v41  ;;  %v95_v46 = vadd.f32 %v93_v40, %v78_v42  ;;  %v96_v47 = vadd.f32 %v93_v40, %v85_v43  ;;  %v97_v48 = vadd.f32 %v93_v40, %v92_v44 }
  0xa1   :  { %v207_v49 = vmul.f32 -1.442695, %v94_v45  ;;  %v208_v50 = vmul.f32 -1.442695, %v95_v46  ;;  %v209_v51 = vmul.f32 -1.442695, %v96_v47 }
  0xa2   :  { %v210_v52 = vmul.f32 -1.442695, %v97_v48 }
  0xa3   :  { %218 = vpow2.f32 %v207_v49 }
  0xa4   :  { %220 = vpow2.f32 %v208_v50 }
  0xa5   :  { %222 = vpow2.f32 %v209_v51 }
  0xa6   :  { %224 = vpow2.f32 %v210_v52 }
  0xa9   :  { %v219_v53 = vpop.eup %218 }
  0xaa   :  { %v221_v54 = vpop.eup %220  ;;  %v110_v55 = vadd.f32 1.0, %v219_v53 }
  0xab   :  { %v223_v56 = vpop.eup %222  ;;  %v111_v57 = vadd.f32 1.0, %v221_v54 }
  0xac   :  { %v225_v58 = vpop.eup %224  ;;  %v333_v59 = vadd.f32 1.0, %v223_v56  ;;  %226 = vrcp.f32 %v110_v55  ;;  %v125_v1 = vand.u32 2147483648, %v110_v55  ;;  %vm119_vm1 = vweird.f32 %v110_v55 }
  0xad   :  { %v113_v60 = vadd.f32 1.0, %v225_v58  ;;  %228 = vrcp.f32 %v111_v57  ;;  %v123_v6 = vand.u32 2147483647, %v110_v55  ;;  %vm134_vm2 = vweird.f32 %v111_v57 }
  0xae   :  { %230 = vrcp.f32 %v333_v59  ;;  %v140_v10 = vand.u32 2147483648, %v111_v57  ;;  %v126_v14 = vor.u32 1.1754944e-38, %v125_v1  ;;  %v138_v16 = vand.u32 2147483647, %v111_v57 }
  0xaf   :  { %232 = vrcp.f32 %v113_v60  ;;  %vm149_vm5 = vweird.f32 %v333_v59  ;;  %v170_v23 = vand.u32 2147483648, %v113_v60  ;;  %v168_v26 = vand.u32 2147483647, %v113_v60 }
  0xb0   :  { %v141_v22 = vor.u32 1.1754944e-38, %v140_v10  ;;  %vm139_vm10 = vcmp.eq.f32.partialorder %v138_v16, 8.507059e+37  ;;  %v155_v29 = vand.u32 2147483648, %v333_v59  ;;  %v153_v32 = vand.u32 2147483647, %v333_v59 }
  0xb1   :  { %vm164_vm12 = vweird.f32 %v113_v60  ;;  %vm124_vm13 = vcmp.eq.f32.partialorder %v123_v6, 8.507059e+37  ;;  %v171_v34 = vor.u32 1.1754944e-38, %v170_v23  ;;  %vm169_vm15 = vcmp.eq.f32.partialorder %v168_v26, 8.507059e+37 }
  0xb2   :  { %v227_v61 = vpop.eup %226  ;;  %v156_v39 = vor.u32 1.1754944e-38, %v155_v29 }
  0xb3   :  { %v229_v62 = vpop.eup %228  ;;  %v115_v63 = vmul.f32 %v227_v61, %v110_v55  ;;  %vm120_vm3 = vweird.f32 %v227_v61 }
  0xb4   :  { %v231_v0 = vpop.eup %230  ;;  %v130_v2 = vmul.f32 %v229_v62, %v111_v57  ;;  %vm135_vm4 = vweird.f32 %v229_v62  ;;  %vm339_vm6 = vmor %vm119_vm1, %vm120_vm3  ;;  %vm154_vm1 = vcmp.eq.f32.partialorder %v153_v32, 8.507059e+37 }
  0xb5   :  { %v116_v3 = vsub.f32 1.0, %v115_v63  ;;  %v145_v4 = vmul.f32 %v231_v0, %v333_v59  ;;  %v233_v5 = vpop.eup %232  ;;  %vm150_vm7 = vweird.f32 %v231_v0  ;;  %vm136_vm8 = vmor %vm134_vm2, %vm135_vm4 }
  0xb6   :  { %v131_v9 = vsub.f32 1.0, %v130_v2  ;;  %v160_v13 = vmul.f32 %v233_v5, %v113_v60  ;;  %vm165_vm9 = vweird.f32 %v233_v5  ;;  %vm349_vm11 = vmor %vm149_vm5, %vm150_vm7 }
  0xb7   :  { %v117_v11 = vmul.f32 %v227_v61, %v116_v3  ;;  %v146_v12 = vsub.f32 1.0, %v145_v4  ;;  %vm166_vm14 = vmor %vm164_vm12, %vm165_vm9 }
  0xb8   :  { %v132_v15 = vmul.f32 %v229_v62, %v131_v9  ;;  %v161_v19 = vsub.f32 1.0, %v160_v13 }
  0xb9   :  { %v118_v17 = vadd.f32 %v227_v61, %v117_v11  ;;  %v147_v18 = vmul.f32 %v231_v0, %v146_v12 }
  0xba   :  { %v133_v21 = vadd.f32 %v229_v62, %v132_v15  ;;  %v162_v25 = vmul.f32 %v233_v5, %v161_v19 }
  0xbb   :  { %v148_v24 = vadd.f32 %v231_v0, %v147_v18  ;;  %v122_v27 = vsel %vm339_vm6, %v227_v61, %v118_v17 }
  0xbc   :  { %v137_v28 = vsel %vm136_vm8, %v229_v62, %v133_v21  ;;  %v163_v33 = vadd.f32 %v233_v5, %v162_v25  ;;  %v127_v36 = vsel %vm124_vm13, %v126_v14, %v122_v27 }
  0xbd   :  { %v142_v30 = vsel %vm139_vm10, %v141_v22, %v137_v28  ;;  %v152_v37 = vsel %vm349_vm11, %v231_v0, %v148_v24 }
  0xbe   :  { %v178_v35 = vrot.slane %v142_v30, 4  ;;  %v167_v38 = vsel %vm166_vm14, %v233_v5, %v163_v33  ;;  %v157_v44 = vsel %vm154_vm1, %v156_v39, %v152_v37 }
  0xbf   :  { %v172_v40 = vsel %vm169_vm15, %v171_v34, %v167_v38 }
  0xc0   :  { %v180_v41 = vsel %vm64_vm0, %v127_v36, %v178_v35  ;;  %v179_v42 = vrot.slane %v172_v40, 4 }
  0xc1   :  { %v184_v43 = vmul.f32 %v180_v41, %v320_v7 }
  0xc2   :  { %v181_v45 = vsel %vm64_vm0, %v157_v44, %v179_v42 }
  0xc3   :  { %186 = vst [vmem:[#allocation6] sm:$0xff] %v184_v43  ;;  %v185_v46 = vmul.f32 %v181_v45, %v322_v8 }
  0xc5   :  { %187 = vst [vmem:[#allocation6 + $0x8] sm:$0xff] %v185_v46 }
  0xc6   :  { %200 = dma.vmem_to_hbm [thread:$0]  %s193_s21, 256, %s195_s24, [#allocation5], %s287_s17, %s287_s17, %s288_s18  }
  0xc7   :  { %284 = dma.done.wait [#allocation5], 256  }
  0xc8   :  { %285 = vsyncadd [#allocation5], 4294967040 }
  0xc9   :  { %205 = vsyncpa [#allocation4], 1 }
  0xca   :  { %206 = vsyncpa [#allocation5], 1 }

</bundles_post_ra>
